<compile_context>
chip_gen: v7x
topology: tpu7x:2x2x1
jax: 0.10.0
libtpu: 0.0.40
codegen_flags: <defaults>
</compile_context>

<pallas_src>
import jax
import jax.numpy as jnp
from jax.experimental import pallas as pl
from jax.experimental.pallas import tpu as pltpu

# ----------------------------- model hyper-params -----------------------------
SEQ_LEN = 16          # seq_len
EMBED_LEN = 32        # embed_len
VOCAB = 50            # token2idx_len
CHANNEL = 128         # self.channel
KERNEL_SIZE = 5       # conv kernel_size
NUM_CLASSES = 10      # dense_layer_1 out_features
L_OUT = SEQ_LEN - KERNEL_SIZE + 1   # 12 valid conv positions

VOCAB_PAD = 128       # one-hot lane width per tap (>= VOCAB, multiple of 128)
KPACK = KERNEL_SIZE * VOCAB_PAD     # 640-deep packed contraction dim
OUT_PAD = 128         # lane-dense classifier width (sliced to 10 in the wrapper)


# ------------------------------- Pallas kernel --------------------------------
def cnn_kernel(tok_ref, twhi_ref, twlo_ref, bconv_ref, wdense_ref, bdense_ref,
               out_ref):
    """Fused embedding + conv1d + ReLU + global max-pool + linear, one batch tile.

    tok_ref    : (TB*S, K)     int32  tokens pre-shifted per conv tap
    twhi_ref   : (K*128, C)    bf16   hi part of per-tap (emb_table @ conv_w_k)
    twlo_ref   : (K*128, C)    bf16   lo (residual) part of the same
    bconv_ref  : (1, C)        f32    conv bias
    wdense_ref : (C, OUT_PAD)  f32    dense weight, zero-padded to 128 cols
    bdense_ref : (1, OUT_PAD)  f32    dense bias,   zero-padded to 128 cols
    out_ref    : (TB, OUT_PAD) f32    padded logits
    """
    n_rows = tok_ref.shape[0]            # TB * SEQ_LEN (static)
    tb = n_rows // SEQ_LEN

    toks = tok_ref[...]                                               # (N, K)
    lane = jax.lax.broadcasted_iota(jnp.int32, (n_rows, VOCAB_PAD), 1)

    # K-packed one-hot block: lane chunk k (128 wide, tile-aligned) holds
    # one_hot(tok[b, t+k]).  Compares/casts stay f32 (native on every TPU gen);
    # a single bf16 cast feeds the MXU (one-hot values 0/1 are exact in bf16).
    parts = [(lane == toks[:, k:k + 1]).astype(jnp.float32)
             for k in range(KERNEL_SIZE)]
    oh_block = jnp.concatenate(parts, axis=1).astype(jnp.bfloat16)    # (N, 640)

    # Conv1d(k=5) with the embedding gather fused in, as a single K=640
    # contraction; the bf16 hi/lo split recovers ~f32 accuracy in two native
    # bf16 MXU passes (vs ~3x-cost emulated-f32 passes).
    acc = jnp.dot(oh_block, twhi_ref[...], preferred_element_type=jnp.float32)
    acc = acc + jnp.dot(oh_block, twlo_ref[...],
                        preferred_element_type=jnp.float32)           # (N, C)

    # Bias + ReLU, applied once.
    acc = jnp.maximum(acc + bconv_ref[...], 0.0)                      # (N, C)

    # Global max pool over the valid conv positions.  Rows t >= L_OUT contain
    # garbage from the shifted-token tail and are forced to 0 via a select —
    # safe because ReLU output is >= 0, so a zero can never win the max.
    acc3 = acc.reshape(tb, SEQ_LEN, CHANNEL)
    valid = jax.lax.broadcasted_iota(jnp.int32, (SEQ_LEN, CHANNEL), 0) < L_OUT
    pooled = jnp.max(jnp.where(valid, acc3, 0.0), axis=1)             # (TB, C)

    # Classifier: lane-dense 128-wide store (sliced to 10 in the wrapper).
    # Kept in f32: the (TB,128)x(128,128) matmul is ~1% of the conv MXU work.
    out_ref[...] = (
        jnp.dot(pooled, wdense_ref[...], preferred_element_type=jnp.float32)
        + bdense_ref[...]
    )


# ------------------------- one-time weight preparation -------------------------
def prepare_params(emb_table, w_conv, b_conv, w_dense, b_dense):
    """Hoisted weight prep — call once per weight set, not per forward.

    Folds the embedding table into the conv weight per tap
        tw[k, v, c] = sum_e table[v, e] * w_conv[c, e, k]
    stacks the taps along the contraction axis (tap-major, 640 rows) and splits
    into a bf16 hi/lo pair so the kernel can do two exact-ish bf16 MXU passes.
    """
    table_pad = jnp.zeros((VOCAB_PAD, EMBED_LEN), jnp.float32)
    table_pad = table_pad.at[: emb_table.shape[0]].set(
        emb_table.astype(jnp.float32))
    w_t = jnp.transpose(w_conv.astype(jnp.float32), (2, 1, 0))        # (K, E, C)
    tw = jnp.einsum('ve,kec->kvc', table_pad, w_t)                    # (K, 128, C)
    tw = tw.reshape(KPACK, CHANNEL)                                   # (640, C)
    tw_hi = tw.astype(jnp.bfloat16)
    tw_lo = (tw - tw_hi.astype(jnp.float32)).astype(jnp.bfloat16)

    b_conv_m = b_conv.reshape(1, CHANNEL).astype(jnp.float32)

    # Lane-dense classifier: zero-pad 10 -> 128 output columns.
    w_dense_m = jnp.zeros((CHANNEL, OUT_PAD), jnp.float32)
    w_dense_m = w_dense_m.at[:, :NUM_CLASSES].set(
        jnp.transpose(w_dense).astype(jnp.float32))
    b_dense_m = jnp.zeros((1, OUT_PAD), jnp.float32)
    b_dense_m = b_dense_m.at[:, :NUM_CLASSES].set(b_dense.astype(jnp.float32))
    return tw_hi, tw_lo, b_conv_m, w_dense_m, b_dense_m


# --------------------------------- wrapper ------------------------------------
def cnn_forward(tokens, params, *, tb=32):
    """tokens: (B, S) int32, params: output of prepare_params().  Returns (B, 10).

    tb = batch tile per grid step (512 matmul rows by default; tb=64 also fits —
    per-step VMEM stays well under 8 MiB on every generation).
    """
    tw_hi, tw_lo, b_conv_m, w_dense_m, b_dense_m = params
    B, S = tokens.shape
    assert S == SEQ_LEN

    if B <= tb:
        # Whole batch fits one tile; split in two when possible so both
        # TensorCores get work on dual-TC parts (v7x).
        tb = B // 2 if (B >= 16 and B % 16 == 0) else B
    else:
        assert tb % 8 == 0, "batch tile must be a multiple of 8 when gridding"
    b_pad = pl.cdiv(B, tb) * tb
    tokens_p = jnp.pad(tokens.astype(jnp.int32), ((0, b_pad - B), (0, 0)))

    # Pre-shift tokens per conv tap: shifted[b*S + t, k] = tokens[b, t+k]
    # (zero past each row end; those rows are masked out of the pool in-kernel).
    shifted = jnp.stack(
        [jnp.pad(tokens_p[:, k:], ((0, 0), (0, k))) for k in range(KERNEL_SIZE)],
        axis=-1,
    ).reshape(b_pad * SEQ_LEN, KERNEL_SIZE)

    n_rows = tb * SEQ_LEN
    out = pl.pallas_call(
        cnn_kernel,
        out_shape=jax.ShapeDtypeStruct((b_pad, OUT_PAD), jnp.float32),
        grid=(b_pad // tb,),
        in_specs=[
            pl.BlockSpec((n_rows, KERNEL_SIZE), lambda i: (i, 0)),    # tokens
            pl.BlockSpec((KPACK, CHANNEL), lambda i: (0, 0)),         # tw hi
            pl.BlockSpec((KPACK, CHANNEL), lambda i: (0, 0)),         # tw lo
            pl.BlockSpec((1, CHANNEL), lambda i: (0, 0)),             # b_conv
            pl.BlockSpec((CHANNEL, OUT_PAD), lambda i: (0, 0)),       # w_dense
            pl.BlockSpec((1, OUT_PAD), lambda i: (0, 0)),             # b_dense
        ],
        out_specs=pl.BlockSpec((tb, OUT_PAD), lambda i: (i, 0)),
        compiler_params=pltpu.CompilerParams(
            dimension_semantics=("parallel",)),
    )(shifted, tw_hi, tw_lo, b_conv_m, w_dense_m, b_dense_m)

    return out[:B, :NUM_CLASSES]


# ----------------------------- pure-JAX reference ------------------------------
def cnn_reference(tokens, emb_table, w_conv, b_conv, w_dense, b_dense):
    emb = emb_table[tokens].astype(jnp.float32)                        # (B, S, E)
    # conv1d: out[b, t, c] = sum_{e,k} emb[b, t+k, e] * w_conv[c, e, k] + b_conv[c]
    patches = jnp.stack([emb[:, k:k + L_OUT, :] for k in range(KERNEL_SIZE)],
                        axis=-1)                                       # (B, L_OUT, E, K)
    conv = jnp.einsum('btek,cek->btc', patches, w_conv) + b_conv       # (B, L_OUT, C)
    conv = jnp.maximum(conv, 0.0)
    pooled = jnp.max(conv, axis=1)                                     # (B, C)
    return pooled @ w_dense.T + b_dense                                # (B, 10)


# --------------------------------- main ---------------------------------------
if __name__ == "__main__":
    key = jax.random.PRNGKey(0)
    k_tok, k_emb, k_wc, k_bc, k_wd, k_bd = jax.random.split(key, 6)

    B = 2
    tokens = jax.random.randint(k_tok, (B, SEQ_LEN), 0, VOCAB, dtype=jnp.int32)

    # Deterministic synthetic parameters (shapes match the PyTorch module).
    emb_table = jax.random.normal(k_emb, (VOCAB, EMBED_LEN), jnp.float32) * 0.1
    w_conv = jax.random.normal(k_wc, (CHANNEL, EMBED_LEN, KERNEL_SIZE),
                               jnp.float32) * 0.05
    b_conv = jax.random.normal(k_bc, (CHANNEL,), jnp.float32) * 0.05
    w_dense = jax.random.normal(k_wd, (NUM_CLASSES, CHANNEL), jnp.float32) * 0.05
    b_dense = jax.random.normal(k_bd, (NUM_CLASSES,), jnp.float32) * 0.05

    # Weight prep is hoisted: done once, reused by every forward call.
    params = prepare_params(emb_table, w_conv, b_conv, w_dense, b_dense)

    out = cnn_forward(tokens, params)
    jax.block_until_ready(out)
    assert out.shape == (B, NUM_CLASSES) and out.dtype == jnp.float32

    ref = cnn_reference(tokens, emb_table, w_conv, b_conv, w_dense, b_dense)
    assert jnp.allclose(out, ref, atol=1e-4, rtol=1e-4), (
        f"mismatch: max abs diff {jnp.max(jnp.abs(out - ref))}")

    print("KERNEL_OK")
</pallas_src>

<mosaic_0001>
module attributes {stable_mosaic.version = 11 : i64} {
  func.func @cnn_kernel(%arg0: i32, %arg1: memref<32x5xi32, #tpu.memory_space<vmem>>, %arg2: memref<640x128xbf16, #tpu.memory_space<vmem>>, %arg3: memref<640x128xbf16, #tpu.memory_space<vmem>>, %arg4: memref<1x128xf32, #tpu.memory_space<vmem>>, %arg5: memref<128x128xf32, #tpu.memory_space<vmem>>, %arg6: memref<1x128xf32, #tpu.memory_space<vmem>>, %arg7: memref<2x128xf32, #tpu.memory_space<vmem>>) attributes {dimension_semantics = [#tpu.dimension_semantics<parallel>], iteration_bounds = array<i64: 1>, scalar_prefetch = 0 : i64, scratch_operands = 0 : i64, tpu.core_type = #tpu.core_type<tc>, window_params = [{transform_indices = @transform_0, window_bounds = array<i64: 32, 5>}, {pipeline_mode = #tpu.pipeline_mode<synchronous>, transform_indices = @transform_1, window_bounds = array<i64: 640, 128>}, {pipeline_mode = #tpu.pipeline_mode<synchronous>, transform_indices = @transform_2, window_bounds = array<i64: 640, 128>}, {pipeline_mode = #tpu.pipeline_mode<synchronous>, transform_indices = @transform_3, window_bounds = array<i64: 1, 128>}, {pipeline_mode = #tpu.pipeline_mode<synchronous>, transform_indices = @transform_4, window_bounds = array<i64: 128, 128>}, {pipeline_mode = #tpu.pipeline_mode<synchronous>, transform_indices = @transform_5, window_bounds = array<i64: 1, 128>}, {transform_indices = @transform_6, window_bounds = array<i64: 2, 128>}]} {
    %c0 = arith.constant 0 : index
    %c0_0 = arith.constant 0 : index
    %0 = vector.load %arg1[%c0, %c0_0] : memref<32x5xi32, #tpu.memory_space<vmem>>, vector<32x5xi32>
    %1 = tpu.iota {dimensions = array<i32: 1>} : vector<32x128xi32>
    %2 = vector.extract_strided_slice %0 {offsets = [0, 0], sizes = [32, 1], strides = [1, 1]} : vector<32x5xi32> to vector<32x1xi32>
    %3 = vector.broadcast %2 : vector<32x1xi32> to vector<32x128xi32>
    %4 = arith.cmpi eq, %1, %3 : vector<32x128xi32>
    %5 = arith.extui %4 : vector<32x128xi1> to vector<32x128xi32>
    %6 = arith.sitofp %5 : vector<32x128xi32> to vector<32x128xf32>
    %7 = vector.extract_strided_slice %0 {offsets = [0, 1], sizes = [32, 1], strides = [1, 1]} : vector<32x5xi32> to vector<32x1xi32>
    %8 = vector.broadcast %7 : vector<32x1xi32> to vector<32x128xi32>
    %9 = arith.cmpi eq, %1, %8 : vector<32x128xi32>
    %10 = arith.extui %9 : vector<32x128xi1> to vector<32x128xi32>
    %11 = arith.sitofp %10 : vector<32x128xi32> to vector<32x128xf32>
    %12 = vector.extract_strided_slice %0 {offsets = [0, 2], sizes = [32, 1], strides = [1, 1]} : vector<32x5xi32> to vector<32x1xi32>
    %13 = vector.broadcast %12 : vector<32x1xi32> to vector<32x128xi32>
    %14 = arith.cmpi eq, %1, %13 : vector<32x128xi32>
    %15 = arith.extui %14 : vector<32x128xi1> to vector<32x128xi32>
    %16 = arith.sitofp %15 : vector<32x128xi32> to vector<32x128xf32>
    %17 = vector.extract_strided_slice %0 {offsets = [0, 3], sizes = [32, 1], strides = [1, 1]} : vector<32x5xi32> to vector<32x1xi32>
    %18 = vector.broadcast %17 : vector<32x1xi32> to vector<32x128xi32>
    %19 = arith.cmpi eq, %1, %18 : vector<32x128xi32>
    %20 = arith.extui %19 : vector<32x128xi1> to vector<32x128xi32>
    %21 = arith.sitofp %20 : vector<32x128xi32> to vector<32x128xf32>
    %22 = vector.extract_strided_slice %0 {offsets = [0, 4], sizes = [32, 1], strides = [1, 1]} : vector<32x5xi32> to vector<32x1xi32>
    %23 = vector.broadcast %22 : vector<32x1xi32> to vector<32x128xi32>
    %24 = arith.cmpi eq, %1, %23 : vector<32x128xi32>
    %25 = arith.extui %24 : vector<32x128xi1> to vector<32x128xi32>
    %26 = arith.sitofp %25 : vector<32x128xi32> to vector<32x128xf32>
    %27 = tpu.concatenate %6, %11, %16, %21, %26 in 1 : vector<32x128xf32>, vector<32x128xf32>, vector<32x128xf32>, vector<32x128xf32>, vector<32x128xf32> -> vector<32x640xf32>
    %28 = arith.truncf %27 : vector<32x640xf32> to vector<32x640xbf16>
    %c0_1 = arith.constant 0 : index
    %c0_2 = arith.constant 0 : index
    %29 = vector.load %arg2[%c0_1, %c0_2] : memref<640x128xbf16, #tpu.memory_space<vmem>>, vector<640x128xbf16>
    %cst = arith.constant dense<0.000000e+00> : vector<32x128xf32>
    %30 = tpu.matmul %28, %29, %cst {dimension_numbers = #tpu.dot_dimension_numbers<[1], [0], [0], [1], [0, 0, 1, 1], [], []>} : vector<32x640xbf16>, vector<640x128xbf16>, vector<32x128xf32> -> vector<32x128xf32>
    %c0_3 = arith.constant 0 : index
    %c0_4 = arith.constant 0 : index
    %31 = vector.load %arg3[%c0_3, %c0_4] : memref<640x128xbf16, #tpu.memory_space<vmem>>, vector<640x128xbf16>
    %cst_5 = arith.constant dense<0.000000e+00> : vector<32x128xf32>
    %32 = tpu.matmul %28, %31, %cst_5 {dimension_numbers = #tpu.dot_dimension_numbers<[1], [0], [0], [1], [0, 0, 1, 1], [], []>} : vector<32x640xbf16>, vector<640x128xbf16>, vector<32x128xf32> -> vector<32x128xf32>
    %33 = arith.addf %30, %32 : vector<32x128xf32>
    %c0_6 = arith.constant 0 : index
    %c0_7 = arith.constant 0 : index
    %34 = vector.load %arg4[%c0_6, %c0_7] : memref<1x128xf32, #tpu.memory_space<vmem>>, vector<1x128xf32>
    %35 = vector.broadcast %34 : vector<1x128xf32> to vector<32x128xf32>
    %36 = arith.addf %33, %35 : vector<32x128xf32>
    %cst_8 = arith.constant 0.000000e+00 : f32
    %37 = vector.broadcast %cst_8 : f32 to vector<32x128xf32>
    %38 = arith.maximumf %36, %37 : vector<32x128xf32>
    %39 = vector.shape_cast %38 : vector<32x128xf32> to vector<2x16x128xf32>
    %40 = tpu.iota {dimensions = array<i32: 0>} : vector<16x128xi32>
    %c12_i32 = arith.constant 12 : i32
    %41 = vector.broadcast %c12_i32 : i32 to vector<16x128xi32>
    %42 = arith.cmpi slt, %40, %41 : vector<16x128xi32>
    %cst_9 = arith.constant 0.000000e+00 : f32
    %43 = vector.shape_cast %42 : vector<16x128xi1> to vector<1x16x128xi1>
    %44 = vector.broadcast %43 : vector<1x16x128xi1> to vector<2x16x128xi1>
    %45 = vector.broadcast %cst_9 : f32 to vector<2x16x128xf32>
    %46 = arith.select %44, %39, %45 : vector<2x16x128xi1>, vector<2x16x128xf32>
    %cst_10 = arith.constant dense<0xFF800000> : vector<2x128xf32>
    %47 = vector.multi_reduction <maximumf>, %46, %cst_10 [1] : vector<2x16x128xf32> to vector<2x128xf32>
    %c0_11 = arith.constant 0 : index
    %c0_12 = arith.constant 0 : index
    %48 = vector.load %arg5[%c0_11, %c0_12] : memref<128x128xf32, #tpu.memory_space<vmem>>, vector<128x128xf32>
    %cst_13 = arith.constant dense<0.000000e+00> : vector<2x128xf32>
    %49 = tpu.matmul %47, %48, %cst_13 {dimension_numbers = #tpu.dot_dimension_numbers<[1], [0], [0], [1], [0, 0, 1, 1], [], []>} : vector<2x128xf32>, vector<128x128xf32>, vector<2x128xf32> -> vector<2x128xf32>
    %c0_14 = arith.constant 0 : index
    %c0_15 = arith.constant 0 : index
    %50 = vector.load %arg6[%c0_14, %c0_15] : memref<1x128xf32, #tpu.memory_space<vmem>>, vector<1x128xf32>
    %51 = vector.broadcast %50 : vector<1x128xf32> to vector<2x128xf32>
    %52 = arith.addf %49, %51 : vector<2x128xf32>
    %c0_16 = arith.constant 0 : index
    %c0_17 = arith.constant 0 : index
    %53 = vector.load %arg7[%c0_16, %c0_17] : memref<2x128xf32, #tpu.memory_space<vmem>>, vector<2x128xf32>
    tpu.vector_store %arg7[%c0_16, %c0_17], %52 {strides = array<i32>} : memref<2x128xf32, #tpu.memory_space<vmem>>, vector<2x128xf32>,
    return
  }
  func.func @transform_0(%arg0: i32) -> (i32, i32) {
    %c0_i32 = arith.constant 0 : i32
    %c0_i32_0 = arith.constant 0 : i32
    return %arg0, %c0_i32 : i32, i32
  }
  func.func @transform_1(%arg0: i32) -> (i32, i32) {
    %c0_i32 = arith.constant 0 : i32
    %c0_i32_0 = arith.constant 0 : i32
    %c0_i32_1 = arith.constant 0 : i32
    return %c0_i32, %c0_i32_0 : i32, i32
  }
  func.func @transform_2(%arg0: i32) -> (i32, i32) {
    %c0_i32 = arith.constant 0 : i32
    %c0_i32_0 = arith.constant 0 : i32
    %c0_i32_1 = arith.constant 0 : i32
    return %c0_i32, %c0_i32_0 : i32, i32
  }
  func.func @transform_3(%arg0: i32) -> (i32, i32) {
    %c0_i32 = arith.constant 0 : i32
    %c0_i32_0 = arith.constant 0 : i32
    %c0_i32_1 = arith.constant 0 : i32
    return %c0_i32, %c0_i32_0 : i32, i32
  }
  func.func @transform_4(%arg0: i32) -> (i32, i32) {
    %c0_i32 = arith.constant 0 : i32
    %c0_i32_0 = arith.constant 0 : i32
    %c0_i32_1 = arith.constant 0 : i32
    return %c0_i32, %c0_i32_0 : i32, i32
  }
  func.func @transform_5(%arg0: i32) -> (i32, i32) {
    %c0_i32 = arith.constant 0 : i32
    %c0_i32_0 = arith.constant 0 : i32
    %c0_i32_1 = arith.constant 0 : i32
    return %c0_i32, %c0_i32_0 : i32, i32
  }
  func.func @transform_6(%arg0: i32) -> (i32, i32) {
    %c0_i32 = arith.constant 0 : i32
    %c0_i32_0 = arith.constant 0 : i32
    return %arg0, %c0_i32 : i32, i32
  }
}

</mosaic_0001>

<bundles_post_ra>
// kernel: tpu_custom_call.1
= control target key start
LH: loop header
LB: loop body
LE: loop exit
PB: predicated region body
PF: predicated region fallthrough
CT: control target
= control target key end

     0   :  { %11 = vsyncpa [#allocation3], 0  ;;  %s2160_s0 = inlined_call_operand.vmem [shape: s32[32,5], index: 0, kind: input, shape index: {}]   ;;  %s2161_s1 = inlined_call_operand.hbm [shape: bf16[640,128], index: 1, kind: input, shape index: {}]   ;;  %s2162_s2 = inlined_call_operand.hbm [shape: bf16[640,128], index: 2, kind: input, shape index: {}]   ;;  %s2163_s3 = inlined_call_operand.vmem [shape: f32[1,128], index: 3, kind: input, shape index: {}]   ;;  %s2164_s4 = inlined_call_operand.hbm [shape: f32[128,128], index: 4, kind: input, shape index: {}]   ;;  %s2165_s5 = inlined_call_operand.vmem [shape: f32[1,128], index: 5, kind: input, shape index: {}]   ;;  %s2166_s6 = inlined_call_operand.hbm [shape: f32[2,128], index: 6, kind: output, shape index: {}]  }
   0x1   :  { %12 = vsyncpa [#allocation6], 0 }
   0x2   :  { %13 = vsyncpa [#allocation4], 0  ;;  %s1904_s21 = smov [#allocation5]   ;;  %s1905_s23 = smov [#allocation2]  }
   0x3   :  { %s33_s22 = sshll.u32 %s1904_s21, 4  ;;  %s21_s24 = sshll.u32 %s1905_s23, 4  ;;  %s34_s22 = int_to_ptr.vmem [resolvable:$true] %s33_s22  ;;  %s1956_s24 = int_to_ptr.vmem [resolvable:$true] %s21_s24 }
   0x4   :  { %s1810_s27 = scalar_lea.hbm %s2162_s2, 5120 }
   0x5   :  { %p1811_p0 = scmp.ne.s32.totalorder %s2162_s2, %s1810_s27  ;;  %p1814_p1 = scmp.lt.u32.totalorder %s1810_s27, %s2162_s2 }
   0x7   :  { %p1816_p2 = pnand %p1814_p1, %p1811_p0 }
   0x9   :  { %1819 = shalt.err (!%p1816_p2)
}
   0xa   :  { %s1820_s8 = scalar_lea.vmem %s34_s22, 5120  ;;  %p1825_p4 = scmp.lt.s32.totalorder %s34_s22, %s34_s22 }
   0xb   :  { %p1821_p3 = scmp.ne.s32.totalorder %s34_s22, %s1820_s8  ;;  %p1826_p5 = scmp.lt.s32.totalorder %s1820_s8, %s1820_s8 }
   0xd   :  { %p1827_p6 = por %p1826_p5, %p1825_p4 }
   0xf   :  { %p1828_p7 = pnand %p1827_p6, %p1821_p3 }
  0x11   :  { %1831 = shalt.err (!%p1828_p7)
}
  0x12   :  { %s1906_s9 = smov 64   ;;  %s1907_s10 = smov 4  }
  0x13   :  { %39 = dma.hbm_to_vmem [thread:$0]  %s2162_s2, 5120, %s34_s22, [#allocation6], %s1906_s9, %s1906_s9, %s1907_s10  }
  0x14   :  { %s1832_s15 = scalar_lea.hbm %s2161_s1, 5120 }
  0x15   :  { %p1833_p8 = scmp.ne.s32.totalorder %s2161_s1, %s1832_s15  ;;  %p1836_p9 = scmp.lt.u32.totalorder %s1832_s15, %s2161_s1 }
  0x17   :  { %p1838_p10 = pnand %p1836_p9, %p1833_p8 }
  0x19   :  { %1841 = shalt.err (!%p1838_p10)
}
  0x1a   :  { %s1842_s20 = scalar_lea.vmem %s1956_s24, 5120  ;;  %p1847_p12 = scmp.lt.s32.totalorder %s1956_s24, %s1956_s24 }
  0x1b   :  { %p1843_p11 = scmp.ne.s32.totalorder %s1956_s24, %s1842_s20  ;;  %p1848_p13 = scmp.lt.s32.totalorder %s1842_s20, %s1842_s20 }
  0x1d   :  { %p1849_p0 = por %p1848_p13, %p1847_p12 }
  0x1f   :  { %p1850_p1 = pnand %p1849_p0, %p1843_p11 }
  0x21   :  { %1853 = shalt.err (!%p1850_p1)
}
  0x22   :  { %27 = dma.hbm_to_vmem [thread:$0]  %s2161_s1, 5120, %s1956_s24, [#allocation3], %s1906_s9, %s1906_s9, %s1907_s10  }
  0x23   :  { %s1908_s22 = smov [#allocation7]   ;;  %s1854_s27 = scalar_lea.hbm %s2164_s4, 2048 }
  0x24   :  { %s47_s23 = sshll.u32 %s1908_s22, 4  ;;  %p1855_p2 = scmp.ne.s32.totalorder %s2164_s4, %s1854_s27  ;;  %s48_s23 = int_to_ptr.vmem [resolvable:$true] %s47_s23 }
  0x25   :  { %p1858_p3 = scmp.lt.u32.totalorder %s1854_s27, %s2164_s4 }
  0x27   :  { %p1860_p4 = pnand %p1858_p3, %p1855_p2 }
  0x29   :  { %1863 = shalt.err (!%p1860_p4)
}
  0x2a   :  { %s1864_s8 = scalar_lea.vmem %s48_s23, 2048  ;;  %p1869_p6 = scmp.lt.s32.totalorder %s48_s23, %s48_s23 }
  0x2b   :  { %p1865_p5 = scmp.ne.s32.totalorder %s48_s23, %s1864_s8  ;;  %p1870_p7 = scmp.lt.s32.totalorder %s1864_s8, %s1864_s8 }
  0x2d   :  { %p1871_p8 = por %p1870_p7, %p1869_p6 }
  0x2f   :  { %p1872_p9 = pnand %p1871_p8, %p1865_p5 }
  0x31   :  { %1875 = shalt.err (!%p1872_p9)
}
  0x32   :  { %s1909_s1 = smov 128   ;;  %s1910_s24 = smov 8  }
  0x33   :  { %53 = dma.hbm_to_vmem [thread:$0]  %s2164_s4, 2048, %s48_s23, [#allocation6], %s1909_s1, %s1909_s1, %s1910_s24  }
  0x34   :  { %1898 = dma.done.wait [#allocation3], 5120  }
  0x35   :  { %1899 = vsyncadd [#allocation3], 4294962176 }
  0x36   :  { %1900 = dma.done.wait [#allocation6], 7168  }
  0x37   :  { %1901 = vsyncadd [#allocation6], 4294960128  ;;  %v1911_v0 = vmov 1   ;;  %v1912_v1 = vmov 0   ;;  %v2002_v2 = vld [vmem:[%s2160_s0] sm:$0xff]  ;;  %v2009_v3 = vld [vmem:[%s2160_s0 + $0x8] sm:$0xff]  ;;  %v70_v35 = vlaneseq }
  0x38   :  { %1716 = vset.pattern.permute.xlu0 %v1911_v0  ;;  %1717 = vset.pattern.permute.xlu1 %v1912_v1  ;;  %v1730_v4 = vld [vmem:[#allocation5 + $0x40] sm:$0xff]   ;;  %v1732_v6 = vld [vmem:[#allocation5 + $0x48] sm:$0xff]   ;;  %v1734_v9 = vld [vmem:[#allocation5 + $0x50] sm:$0xff]   ;;  %v1913_v10 = vmov 4   ;;  %v1914_v23 = vmov 3   ;;  %v1915_v27 = vmov 2  }
  0x39   :  { %73 = vperm.xlu1 %1717, %v2002_v2   ;;  %97 = vperm.xlu0 %1716, %v2002_v2   ;;  %v1731_v5 = vld [vmem:[#allocation5] sm:$0xff]   ;;  %v1733_v7 = vld [vmem:[#allocation5 + $0x8] sm:$0xff]   ;;  %v2018_v11 = vld [vmem:[%s2160_s0 + $0x10] sm:$0xff]  ;;  %v2043_v38 = vand.u32 127, %v70_v35  ;;  %v1916_v45 = vmov 1.0|1.0  }
  0x3a   :  { %1435 = vmatprep.subr.bf16.mxu1 %v1730_v4  ;;  %v1735_v8 = vld [vmem:[#allocation5 + $0x100] sm:$0xff]   ;;  %v2023_v12 = vld [vmem:[%s2160_s0 + $0x18] sm:$0xff]  ;;  %v1738_v13 = vld [vmem:[#allocation5 + $0x108] sm:$0xff]   ;;  %v1917_v41 = vmov 0.0|0.0   ;;  %s1920_s20 = smov [#allocation8]  }
  0x3b   :  { %1436 = vmatpush3.bf16.msra.mxu1 %v1731_v5  ;;  %1584 = vmatprep.subr.bf16.mxu0 %v1735_v8  ;;  %v1736_v14 = vld [vmem:[#allocation5 + $0x10] sm:$0xff]   ;;  %v1737_v15 = vld [vmem:[#allocation5 + $0x58] sm:$0xff]   ;;  %v1740_v18 = vld [vmem:[#allocation5 + $0x60] sm:$0xff]   ;;  %s1283_s2 = sshll.u32 %s1920_s20, 4  ;;  %s1284_s2 = int_to_ptr.vmem [resolvable:$true] %s1283_s2 }
  0x3c   :  { %1437 = vmatprep.subr.bf16.mxu1 %v1732_v6  ;;  %1585 = vmatpush3.bf16.msra.mxu0 %v1735_v8  ;;  %v1741_v16 = vld [vmem:[#allocation5 + $0x110] sm:$0xff]   ;;  %v1739_v17 = vld [vmem:[#allocation5 + $0x18] sm:$0xff]   ;;  %v1742_v20 = vld [vmem:[#allocation5 + $0x20] sm:$0xff]   ;;  %s1876_s21 = scalar_lea.vmem %s1284_s2, 32  ;;  %p1881_p11 = scmp.lt.s32.totalorder %s1284_s2, %s1284_s2 }
  0x3d   :  { %76 = vperm.xlu1 %1717, %v2009_v3   ;;  %100 = vperm.xlu0 %1716, %v2009_v3   ;;  %v1744_v19 = vld [vmem:[#allocation5 + $0x118] sm:$0xff]   ;;  %v1743_v21 = vld [vmem:[#allocation5 + $0x68] sm:$0xff]   ;;  %v1747_v22 = vld [vmem:[#allocation5 + $0x120] sm:$0xff]   ;;  %p1877_p10 = scmp.ne.s32.totalorder %s1284_s2, %s1876_s21  ;;  %p1882_p12 = scmp.lt.s32.totalorder %s1876_s21, %s1876_s21 }
  0x3e   :  { %1586 = vmatprep.subr.bf16.mxu0 %v1738_v13  ;;  %v1745_v24 = vld [vmem:[#allocation5 + $0x28] sm:$0xff]   ;;  %v1746_v25 = vld [vmem:[#allocation5 + $0x70] sm:$0xff]   ;;  %v1749_v29 = vld [vmem:[#allocation5 + $0x78] sm:$0xff]  }
  0x3f   :  { %1438 = vmatpush3.bf16.msra.mxu1 %v1733_v7  ;;  %v1750_v26 = vld [vmem:[#allocation5 + $0x128] sm:$0xff]   ;;  %v1748_v28 = vld [vmem:[#allocation5 + $0x30] sm:$0xff]   ;;  %v1751_v31 = vld [vmem:[#allocation5 + $0x38] sm:$0xff]   ;;  %p1883_p13 = por %p1882_p12, %p1881_p11 }
  0x40   :  { %1439 = vmatprep.subr.bf16.mxu1 %v1734_v9  ;;  %1587 = vmatpush3.bf16.msra.mxu0 %v1738_v13  ;;  %v1753_v30 = vld [vmem:[#allocation5 + $0x130] sm:$0xff]   ;;  %v1752_v32 = vld [vmem:[#allocation5 + $0xc0] sm:$0xff]   ;;  %v1756_v33 = vld [vmem:[#allocation5 + $0x138] sm:$0xff]  }
  0x41   :  { %1719 = vset.pattern.permute.xlu1 %v1913_v10  ;;  %1718 = vset.pattern.permute.xlu0 %v1913_v10  ;;  %v1759_v34 = vld [vmem:[#allocation2 + $0xc0] sm:$0xff]   ;;  %v1755_v44 = vld [vmem:[#allocation5 + $0xc8] sm:$0xff]   ;;  %v1758_v50 = vld [vmem:[#allocation5 + $0xd0] sm:$0xff]   ;;  %p1884_p0 = pnand %p1883_p13, %p1877_p10 }
  0x42   :  { %172 = vperm.xlu1 %1719, %v2009_v3   ;;  %169 = vperm.xlu0 %1718, %v2002_v2   ;;  %v1754_v42 = vld [vmem:[#allocation5 + $0x80] sm:$0xff]   ;;  %v1757_v48 = vld [vmem:[#allocation5 + $0x88] sm:$0xff]   ;;  %v1760_v54 = vld [vmem:[#allocation5 + $0x90] sm:$0xff]  }
  0x43   :  { %1440 = vmatpush3.bf16.msra.mxu1 %v1736_v14  ;;  %1588 = vmatprep.subr.bf16.mxu0 %v1741_v16  ;;  %v1761_v53 = vld [vmem:[#allocation2 + $0x80] sm:$0xff]   ;;  %v1763_v55 = vld [vmem:[#allocation2 + $0xc8] sm:$0xff]   ;;  %v1762_v57 = vld [vmem:[#allocation5 + $0xd8] sm:$0xff]  }
  0x44   :  { %1441 = vmatprep.subr.bf16.mxu1 %v1737_v15  ;;  %1589 = vmatpush3.bf16.msra.mxu0 %v1741_v16  ;;  %v1765_v58 = vld [vmem:[#allocation2 + $0x88] sm:$0xff]   ;;  %v1764_v61 = vld [vmem:[#allocation5 + $0x98] sm:$0xff]   ;;  %v1767_v62 = vld [vmem:[#allocation2 + $0xd0] sm:$0xff]  }
  0x45   :  { %1590 = vmatprep.subr.bf16.mxu0 %v1744_v19  ;;  %v1766_v63 = vld [vmem:[#allocation5 + $0xe0] sm:$0xff]   ;;  %v1770_v5 = vld [vmem:[#allocation5 + $0xe8] sm:$0xff]   ;;  %v1773_v6 = vld [vmem:[#allocation2 + $0x98] sm:$0xff]  }
  0x46   :  { %175 = vperm.xlu1 %1719, %v2018_v11   ;;  %178 = vperm.xlu0 %1718, %v2023_v12   ;;  %v1772_v7 = vld [vmem:[#allocation5 + $0xa8] sm:$0xff]   ;;  %v1775_v8 = vld [vmem:[#allocation2 + $0xe0] sm:$0xff]   ;;  %v1776_v14 = vld [vmem:[#allocation5 + $0xb0] sm:$0xff]  }
  0x47   :  { %1442 = vmatpush3.bf16.msra.mxu1 %v1739_v17  ;;  %v1777_v13 = vld [vmem:[#allocation2 + $0xa0] sm:$0xff]   ;;  %v1779_v15 = vld [vmem:[#allocation2 + $0xe8] sm:$0xff]   ;;  %v1778_v16 = vld [vmem:[#allocation5 + $0xf8] sm:$0xff]  }
  0x48   :  { %1443 = vmatprep.subr.bf16.mxu1 %v1740_v18  ;;  %1591 = vmatpush3.bf16.msra.mxu0 %v1744_v19  ;;  %v1781_v18 = vld [vmem:[#allocation2 + $0xa8] sm:$0xff]   ;;  %v1780_v19 = vld [vmem:[#allocation5 + $0xb8] sm:$0xff]  }
  0x49   :  { %1592 = vmatprep.subr.bf16.mxu0 %v1747_v22  ;;  %v1805_v43 = vld [vmem:[#allocation2 + $0x78] sm:$0xff]  }
  0x4a   :  { %1720 = vset.pattern.permute.xlu1 %v1911_v0  ;;  %1721 = vset.pattern.permute.xlu0 %v1911_v0  ;;  %v1809_v49 = vld [vmem:[#allocation2 + $0x138] sm:$0xff]  }
  0x4b   :  { %103 = vperm.xlu1 %1720, %v2018_v11   ;;  %106 = vperm.xlu0 %1721, %v2023_v12  }
  0x4c   :  { %1444 = vmatpush3.bf16.msra.mxu1 %v1742_v20  ;;  %1593 = vmatpush3.bf16.msra.mxu0 %v1747_v22  ;;  %v1783_v20 = vld [vmem:[#allocation2 + $0xf0] sm:$0xff]   ;;  %v1782_v22 = vld [vmem:[#allocation2 + $0x40] sm:$0xff]  }
  0x4d   :  { %1445 = vmatprep.subr.bf16.mxu1 %v1743_v21  ;;  %1594 = vmatprep.subr.bf16.mxu0 %v1750_v26 }
  0x4f   :  { %1722 = vset.pattern.permute.xlu1 %v1912_v1  ;;  %1723 = vset.pattern.permute.xlu0 %v1914_v23  ;;  %v1769_v1 = vld [vmem:[#allocation2 + $0x90] sm:$0xff]  }
  0x50   :  { %79 = vperm.xlu1 %1722, %v2018_v11   ;;  %145 = vperm.xlu0 %1723, %v2002_v2  }
  0x51   :  { %1446 = vmatpush3.bf16.msra.mxu1 %v1745_v24  ;;  %1595 = vmatpush3.bf16.msra.mxu0 %v1750_v26  ;;  %v1785_v24 = vld [vmem:[#allocation2 + $0xb0] sm:$0xff]   ;;  %v1787_v26 = vld [vmem:[#allocation2 + $0xf8] sm:$0xff]  }
  0x52   :  { %1447 = vmatprep.subr.bf16.mxu1 %v1746_v25  ;;  %1596 = vmatprep.subr.bf16.mxu0 %v1753_v30  ;;  %v1784_v25 = vld [vmem:[#allocation2] sm:$0xff]  }
  0x54   :  { %82 = vperm.xlu1 %1722, %v2023_v12   ;;  %1726 = vset.pattern.permute.xlu0 %v1915_v27 }
  0x55   :  { %124 = vperm.xlu0 %1726, %v2009_v3   ;;  %1448 = vmatpush3.bf16.msra.mxu1 %v1748_v28  ;;  %v1786_v28 = vld [vmem:[#allocation2 + $0x48] sm:$0xff]  }
  0x56   :  { %1449 = vmatprep.subr.bf16.mxu1 %v1749_v29  ;;  %1597 = vmatpush3.bf16.msra.mxu0 %v1753_v30  ;;  %v1789_v29 = vld [vmem:[#allocation2 + $0xb8] sm:$0xff]  }
  0x57   :  { %1598 = vmatprep.subr.bf16.mxu0 %v1756_v33 }
  0x58   :  { %1724 = vset.pattern.permute.xlu1 %v1914_v23 }
  0x59   :  { %148 = vperm.xlu1 %1724, %v2009_v3   ;;  %127 = vperm.xlu0 %1726, %v2018_v11   ;;  %v1771_v3 = vld [vmem:[#allocation2 + $0xd8] sm:$0xff]  }
  0x5a   :  { %1450 = vmatpush3.bf16.msra.mxu1 %v1751_v31  ;;  %1599 = vmatpush3.bf16.msra.mxu0 %v1756_v33  ;;  %v1788_v31 = vld [vmem:[#allocation2 + $0x8] sm:$0xff]   ;;  %v1790_v33 = vld [vmem:[#allocation2 + $0x50] sm:$0xff]  }
  0x5b   :  { %1463 = vmatprep.subr.bf16.mxu1 %v1752_v32  ;;  %1529 = vmatprep.subr.bf16.mxu0 %v1759_v34  ;;  %v1791_v32 = vld [vmem:[#allocation2 + $0x100] sm:$0xff]  }
  0x5d   :  { %1725 = vset.pattern.permute.xlu1 %v1915_v27  ;;  %1729 = vset.pattern.permute.xlu0 %v1913_v10  ;;  %v1774_v10 = vld [vmem:[#allocation5 + $0xf0] sm:$0xff]  }
  0x5e   :  { %121 = vperm.xlu1 %1725, %v2002_v2   ;;  %v1768_v2 = vld [vmem:[#allocation5 + $0xa0] sm:$0xff]  }
  0x62   :  { %1727 = vset.pattern.permute.xlu1 %v1914_v23 }
  0x63   :  { %151 = vperm.xlu1 %1727, %v2018_v11   ;;  %v1190_v11 = vld [vmem:[#allocation7 + $0x60] sm:$0xff] }
  0x67   :  { %154 = vperm.xlu1 %1727, %v2023_v12  }
  0x6b   :  { %1728 = vset.pattern.permute.xlu1 %v1915_v27 }
  0x6c   :  { %130 = vperm.xlu1 %1728, %v2023_v12  }
  0xb8   :  { %v74_v36 = vpop.permute.xlu1 %73  ;;  %v98_v37 = vpop.permute.xlu0 %97 }
  0xb9   :  { %vm84_vm0 = vcmp.eq.s32.totalorder %v2043_v38, %v74_v36  ;;  %vm108_vm3 = vcmp.eq.s32.totalorder %v2043_v38, %v98_v37  ;;  %v1792_v36 = vld [vmem:[#allocation2 + $0x10] sm:$0xff]   ;;  %v1794_v37 = vld [vmem:[#allocation2 + $0x108] sm:$0xff]  }
  0xbc   :  { %v77_v39 = vpop.permute.xlu1 %76  ;;  %v101_v40 = vpop.permute.xlu0 %100 }
  0xbd   :  { %vm85_vm1 = vcmp.eq.s32.totalorder %v2043_v38, %v77_v39  ;;  %vm109_vm2 = vcmp.eq.s32.totalorder %v2043_v38, %v101_v40  ;;  %v1793_v39 = vld [vmem:[#allocation2 + $0x58] sm:$0xff]  }
  0xbe   :  { %vm2049_vm4 = vmpackc.low %vm85_vm1, %vm84_vm0 }
  0xbf   :  { %vm2053_vm5 = vmpackc.low %vm109_vm2, %vm108_vm3 }
  0xc0   :  { %1354 = vmatprep.mubr.msk.bf16.mxu1 %vm2053_vm5, %v1916_v45 }
  0xc1   :  { %1356 = vmatmul.mubr.msk.bf16.vlgmr.msra.gmra.mrb[0].mxu1 %vm2049_vm4, %v1916_v45  ;;  %v173_v46 = vpop.permute.xlu1 %172  ;;  %v170_v47 = vpop.permute.xlu0 %169 }
  0xc2   :  { %1464 = vmatpush3.bf16.msra.mxu1 %v1754_v42  ;;  %vm181_vm6 = vcmp.eq.s32.totalorder %v2043_v38, %v173_v46  ;;  %vm180_vm7 = vcmp.eq.s32.totalorder %v2043_v38, %v170_v47  ;;  %v1795_v42 = vld [vmem:[#allocation2 + $0x18] sm:$0xff]   ;;  %v1796_v47 = vld [vmem:[#allocation2 + $0x60] sm:$0xff]  }
  0xc3   :  { %1465 = vmatprep.subr.bf16.mxu1 %v1755_v44  ;;  %vm2065_vm8 = vmpackc.low %vm181_vm6, %vm180_vm7  ;;  %v1797_v44 = vld [vmem:[#allocation2 + $0x110] sm:$0xff]  }
  0xc4   :  { %1600 = vmatprep.mubr.msk.bf16.mxu0 %vm2065_vm8, %v1916_v45 }
  0xc5   :  { %v176_v51 = vpop.permute.xlu1 %175  ;;  %v179_v52 = vpop.permute.xlu0 %178 }
  0xc6   :  { %1466 = vmatpush3.bf16.msra.mxu1 %v1757_v48  ;;  %vm182_vm9 = vcmp.eq.s32.totalorder %v2043_v38, %v176_v51  ;;  %vm183_vm10 = vcmp.eq.s32.totalorder %v2043_v38, %v179_v52  ;;  %v1798_v48 = vld [vmem:[#allocation2 + $0x20] sm:$0xff]   ;;  %v1799_v51 = vld [vmem:[#allocation2 + $0x68] sm:$0xff]  }
  0xc7   :  { %vm2074_vm11 = vmpackc.low %vm183_vm10, %vm182_vm9  ;;  %1467 = vmatprep.subr.bf16.mxu1 %v1758_v50  ;;  %v1800_v50 = vld [vmem:[#allocation2 + $0x118] sm:$0xff]   ;;  %v1803_v52 = vld [vmem:[#allocation2 + $0x120] sm:$0xff]  }
  0xc8   :  { %1601 = vmatmul.mubr.msk.bf16.vlgmr.msra.gmra.mrb[0].mxu0 %vm2074_vm11, %v1916_v45 }
  0xc9   :  { %1530 = vmatpush3.bf16.msra.mxu0 %v1761_v53  ;;  %v1802_v53 = vld [vmem:[#allocation2 + $0x70] sm:$0xff]  }
  0xca   :  { %1468 = vmatpush3.bf16.msra.mxu1 %v1760_v54  ;;  %v104_v59 = vpop.permute.xlu1 %103  ;;  %v107_v60 = vpop.permute.xlu0 %106  ;;  %1531 = vmatprep.subr.bf16.mxu0 %v1763_v55  ;;  %v1804_v54 = vld [vmem:[#allocation2 + $0x30] sm:$0xff]   ;;  %v1806_v55 = vld [vmem:[#allocation2 + $0x128] sm:$0xff]  }
  0xcb   :  { %vm110_vm12 = vcmp.eq.s32.totalorder %v2043_v38, %v104_v59  ;;  %vm111_vm13 = vcmp.eq.s32.totalorder %v2043_v38, %v107_v60  ;;  %1469 = vmatprep.subr.bf16.mxu1 %v1762_v57  ;;  %v1807_v57 = vld [vmem:[#allocation2 + $0x38] sm:$0xff]   ;;  %v1178_v59 = vld [vmem:[#allocation7] sm:$0xff]  ;;  %v1179_v60 = vld [vmem:[#allocation7 + $0x8] sm:$0xff] }
  0xcc   :  { %vm2083_vm14 = vmpackc.low %vm111_vm13, %vm110_vm12 }
  0xcd   :  { %1532 = vmatpush3.bf16.msra.mxu0 %v1765_v58  ;;  %1358 = vmatprep.mubr.msk.bf16.mxu1 %vm2083_vm14, %v1916_v45  ;;  %v1808_v58 = vld [vmem:[#allocation2 + $0x130] sm:$0xff]  }
  0xce   :  { %1470 = vmatpush3.bf16.msra.mxu1 %v1764_v61  ;;  %1533 = vmatprep.subr.bf16.mxu0 %v1767_v62  ;;  %v1660_v61 = vpack.c.bf16 %v1179_v60, %v1178_v59  ;;  %v1180_v62 = vld [vmem:[#allocation7 + $0x10] sm:$0xff] }
  0xcf   :  { %v80_v4 = vpop.permute.xlu1 %79  ;;  %1471 = vmatprep.subr.bf16.mxu1 %v1766_v63  ;;  %v146_v12 = vpop.permute.xlu0 %145  ;;  %v1181_v63 = vld [vmem:[#allocation7 + $0x18] sm:$0xff] }
  0xd0   :  { %vm86_vm15 = vcmp.eq.s32.totalorder %v2043_v38, %v80_v4  ;;  %vm156_vm2 = vcmp.eq.s32.totalorder %v2043_v38, %v146_v12  ;;  %v1663_v0 = vpack.c.bf16 %v1181_v63, %v1180_v62  ;;  %v1185_v4 = vld [vmem:[#allocation7 + $0x38] sm:$0xff]  ;;  %v1191_v12 = vld [vmem:[#allocation7 + $0x68] sm:$0xff] }
  0xd1   :  { %1534 = vmatpush3.bf16.msra.mxu0 %v1769_v1  ;;  %v1182_v1 = vld [vmem:[#allocation7 + $0x20] sm:$0xff] }
  0xd2   :  { %1472 = vmatpush3.bf16.msra.mxu1 %v1768_v2  ;;  %1535 = vmatprep.subr.bf16.mxu0 %v1771_v3  ;;  %v1183_v2 = vld [vmem:[#allocation7 + $0x28] sm:$0xff]  ;;  %v1184_v3 = vld [vmem:[#allocation7 + $0x30] sm:$0xff] }
  0xd3   :  { %v83_v9 = vpop.permute.xlu1 %82  ;;  %1473 = vmatprep.subr.bf16.mxu1 %v1770_v5  ;;  %v1666_v56 = vpack.c.bf16 %v1183_v2, %v1182_v1  ;;  %v1186_v5 = vld [vmem:[#allocation7 + $0x40] sm:$0xff] }
  0xd4   :  { %vm87_vm0 = vcmp.eq.s32.totalorder %v2043_v38, %v83_v9  ;;  %v125_v21 = vpop.permute.xlu0 %124  ;;  %v1189_v9 = vld [vmem:[#allocation7 + $0x58] sm:$0xff] }
  0xd5   :  { %vm2092_vm1 = vmpackc.low %vm87_vm0, %vm86_vm15  ;;  %1536 = vmatpush3.bf16.msra.mxu0 %v1773_v6  ;;  %vm133_vm7 = vcmp.eq.s32.totalorder %v2043_v38, %v125_v21  ;;  %v1187_v6 = vld [vmem:[#allocation7 + $0x48] sm:$0xff] }
  0xd6   :  { %1474 = vmatpush3.bf16.msra.mxu1 %v1772_v7  ;;  %1537 = vmatprep.subr.bf16.mxu0 %v1775_v8  ;;  %v1672_v7 = vpack.c.bf16 %v1187_v6, %v1186_v5  ;;  %v1188_v8 = vld [vmem:[#allocation7 + $0x50] sm:$0xff] }
  0xd7   :  { %1360 = vmatmul.mubr.msk.bf16.gmra.mrb[4].mxu1 %vm2092_vm1, %v1916_v45  ;;  %1475 = vmatprep.subr.bf16.mxu1 %v1774_v10  ;;  %v1675_v10 = vpack.c.bf16 %v1189_v9, %v1188_v8 }
  0xd8   :  { %v149_v17 = vpop.permute.xlu1 %148  ;;  %v128_v40 = vpop.permute.xlu0 %127 }
  0xd9   :  { %vm157_vm3 = vcmp.eq.s32.totalorder %v2043_v38, %v149_v17  ;;  %1538 = vmatpush3.bf16.msra.mxu0 %v1777_v13  ;;  %vm134_vm0 = vcmp.eq.s32.totalorder %v2043_v38, %v128_v40  ;;  %v1678_v13 = vpack.c.bf16 %v1191_v12, %v1190_v11  ;;  %v1919_v17 = vmov 0.0   ;;  %v1433_v11 = vld [vmem:[%s2163_s3] ss:$0 sm:$0xff] }
  0xda   :  { %vm1361_vm6 = vmpackc.low %vm157_vm3, %vm156_vm2  ;;  %1476 = vmatpush3.bf16.msra.mxu1 %v1776_v14  ;;  %1539 = vmatprep.subr.bf16.mxu0 %v1779_v15  ;;  %v1192_v14 = vld [vmem:[#allocation7 + $0x70] sm:$0xff]  ;;  %v1193_v15 = vld [vmem:[#allocation7 + $0x78] sm:$0xff] }
  0xdb   :  { %1477 = vmatprep.subr.bf16.mxu1 %v1778_v16  ;;  %1362 = vmatprep.mubr.msk.bf16.mxu1 %vm1361_vm6, %v1916_v45  ;;  %v1681_v16 = vpack.c.bf16 %v1193_v15, %v1192_v14 }
  0xdc   :  { %1422 = vmatprep.mubr.msk.bf16.mxu0 %vm1361_vm6, %v1916_v45 }
  0xdd   :  { %1540 = vmatpush3.bf16.msra.mxu0 %v1781_v18  ;;  %v122_v23 = vpop.permute.xlu1 %121 }
  0xde   :  { %1478 = vmatpush3.bf16.msra.mxu1 %v1780_v19  ;;  %vm132_vm9 = vcmp.eq.s32.totalorder %v2043_v38, %v122_v23  ;;  %1541 = vmatprep.subr.bf16.mxu0 %v1783_v20 }
  0xdf   :  { %vm2105_vm10 = vmpackc.low %vm133_vm7, %vm132_vm9  ;;  %1501 = vmatprep.subr.bf16.mxu1 %v1782_v22 }
  0xe1   :  { %1364 = vmatmul.mubr.msk.bf16.vlgmr.msra.gmra.mrb[8].mxu1 %vm2105_vm10, %v1916_v45  ;;  %1542 = vmatpush3.bf16.msra.mxu0 %v1785_v24 }
  0xe2   :  { %1502 = vmatpush3.bf16.msra.mxu1 %v1784_v25  ;;  %v152_v30 = vpop.permute.xlu1 %151  ;;  %1543 = vmatprep.subr.bf16.mxu0 %v1787_v26 }
  0xe3   :  { %1503 = vmatprep.subr.bf16.mxu1 %v1786_v28  ;;  %vm158_vm12 = vcmp.eq.s32.totalorder %v2043_v38, %v152_v30 }
  0xe5   :  { %1544 = vmatpush3.bf16.msra.mxu0 %v1789_v29 }
  0xe6   :  { %1504 = vmatpush3.bf16.msra.mxu1 %v1788_v31  ;;  %v155_v34 = vpop.permute.xlu1 %154  ;;  %1604 = vmatprep.subr.bf16.mxu0 %v1791_v32 }
  0xe7   :  { %vm159_vm13 = vcmp.eq.s32.totalorder %v2043_v38, %v155_v34  ;;  %1505 = vmatprep.subr.bf16.mxu1 %v1790_v33 }
  0xe8   :  { %vm1365_vm15 = vmpackc.low %vm159_vm13, %vm158_vm12  ;;  %1424 = vmatmul.mubr.msk.bf16.vlgmr.msra.gmra.mrb[4].mxu0 %vm2105_vm10, %v1916_v45 }
  0xe9   :  { %1605 = vmatpush3.bf16.msra.mxu0 %v1791_v32  ;;  %1366 = vmatprep.mubr.msk.bf16.mxu1 %vm1365_vm15, %v1916_v45 }
  0xea   :  { %1506 = vmatpush3.bf16.msra.mxu1 %v1792_v36  ;;  %1606 = vmatprep.subr.bf16.mxu0 %v1794_v37 }
  0xeb   :  { %v131_v46 = vpop.permute.xlu1 %130  ;;  %1507 = vmatprep.subr.bf16.mxu1 %v1793_v39  ;;  %1426 = vmatprep.mubr.msk.bf16.mxu0 %vm1365_vm15, %v1916_v45 }
  0xec   :  { %vm135_vm2 = vcmp.eq.s32.totalorder %v2043_v38, %v131_v46  ;;  %v1801_v38 = vld [vmem:[#allocation2 + $0x28] sm:$0xff]  }
  0xed   :  { %vm1367_vm3 = vmpackc.low %vm135_vm2, %vm134_vm0  ;;  %1607 = vmatpush3.bf16.msra.mxu0 %v1794_v37 }
  0xee   :  { %1508 = vmatpush3.bf16.msra.mxu1 %v1795_v42  ;;  %1608 = vmatprep.subr.bf16.mxu0 %v1797_v44 }
  0xef   :  { %1368 = vmatmul.mubr.msk.bf16.gmra.mrb[12].mxu1 %vm1367_vm3, %v1916_v45  ;;  %1509 = vmatprep.subr.bf16.mxu1 %v1796_v47 }
  0xf0   :  { %1414 = vmatprep.mubr.msk.bf16.mxu1 %vm2053_vm5, %v1916_v45  ;;  %1428 = vmatmul.mubr.msk.bf16.gmra.mrb[8].mxu0 %vm1367_vm3, %v1916_v45 }
  0xf1   :  { %1609 = vmatpush3.bf16.msra.mxu0 %v1797_v44  ;;  %1620 = vmatprep.mubr.msk.bf16.mxu0 %vm2065_vm8, %v1916_v45  ;;  %vm1203_vm8 = vcmask 1041409  }
  0xf2   :  { %1510 = vmatpush3.bf16.msra.mxu1 %v1798_v48  ;;  %1610 = vmatprep.subr.bf16.mxu0 %v1800_v50 }
  0xf3   :  { %1511 = vmatprep.subr.bf16.mxu1 %v1799_v51 }
  0xf5   :  { %1611 = vmatpush3.bf16.msra.mxu0 %v1800_v50 }
  0xf6   :  { %1512 = vmatpush3.bf16.msra.mxu1 %v1801_v38  ;;  %1612 = vmatprep.subr.bf16.mxu0 %v1803_v52 }
  0xf7   :  { %1513 = vmatprep.subr.bf16.mxu1 %v1802_v53 }
  0xf9   :  { %1613 = vmatpush3.bf16.msra.mxu0 %v1803_v52 }
  0xfa   :  { %1514 = vmatpush3.bf16.msra.mxu1 %v1804_v54  ;;  %1614 = vmatprep.subr.bf16.mxu0 %v1806_v55 }
  0xfb   :  { %1515 = vmatprep.subr.bf16.mxu1 %v1805_v43 }
  0xfd   :  { %1615 = vmatpush3.bf16.msra.mxu0 %v1806_v55 }
  0xfe   :  { %1516 = vmatpush3.bf16.msra.mxu1 %v1807_v57  ;;  %1616 = vmatprep.subr.bf16.mxu0 %v1808_v58 }
  0xff   :  { %1659 = vmatprep.subr.bf16.mxu1 %v1917_v41 }
 0x101   :  { %1416 = vmatmul.mubr.msk.bf16.vlgmr.msra.gmra.mrb[16].mxu1 %vm2049_vm4, %v1916_v45  ;;  %1617 = vmatpush3.bf16.msra.mxu0 %v1808_v58  ;;  %vm1918_vm4 = vmmov 0  }
 0x102   :  { %1418 = vmatprep.mubr.msk.bf16.mxu1 %vm2083_vm14, %v1916_v45  ;;  %1618 = vmatprep.subr.bf16.mxu0 %v1809_v49 }
 0x103   :  { %1661 = vmatpush3.bf16.msra.mxu1 %v1660_v61 }
 0x104   :  { %1662 = vmatprep.subr.bf16.mxu1 %v1917_v41 }
 0x105   :  { %1619 = vmatpush3.bf16.msra.mxu0 %v1809_v49 }
 0x107   :  { %1664 = vmatpush3.bf16.msra.mxu1 %v1663_v0 }
 0x108   :  { %1621 = vmatmul.mubr.msk.bf16.vlgmr.msra.gmra.mrb[0].mxu0 %vm2074_vm11, %v1916_v45  ;;  %1665 = vmatprep.subr.bf16.mxu1 %v1917_v41 }
 0x109   :  { %1420 = vmatmul.mubr.msk.bf16.gmra.mrb[20].mxu1 %vm2092_vm1, %v1916_v45  ;;  %v1669_v45 = vpack.c.bf16 %v1185_v4, %v1184_v3 }
 0x10a   :  { %1656 = vmatprep.mubr.msk.f32.mxu1 %vm1918_vm4, %v1919_v17 }
 0x10b   :  { %1667 = vmatpush3.bf16.msra.mxu1 %v1666_v56 }
 0x10c   :  { %1668 = vmatprep.subr.bf16.mxu1 %v1917_v41 }
 0x10f   :  { %1670 = vmatpush3.bf16.msra.mxu1 %v1669_v45  ;;  %v1152_v45 = vshrl.u32 %v70_v35, 7 }
 0x110   :  { %1671 = vmatprep.subr.bf16.mxu1 %v1917_v41 }
 0x113   :  { %1673 = vmatpush3.bf16.msra.mxu1 %v1672_v7 }
 0x114   :  { %1674 = vmatprep.subr.bf16.mxu1 %v1917_v41 }
 0x117   :  { %1676 = vmatpush3.bf16.msra.mxu1 %v1675_v10 }
 0x118   :  { %1677 = vmatprep.subr.bf16.mxu1 %v1917_v41 }
 0x11b   :  { %1679 = vmatpush3.bf16.msra.mxu1 %v1678_v13 }
 0x11c   :  { %1680 = vmatprep.subr.bf16.mxu1 %v1917_v41 }
 0x11f   :  { %1682 = vmatpush3.bf16.msra.mxu1 %v1681_v16  ;;  %v1153_v16 = vadd.s32 8, %v1152_v45 }
 0x121   :  { %vm1155_vm5 = vcmp.lt.s32.totalorder %v1153_v16, 12 }
 0x194   :  { %v1451_v18 = vpop.f32.mrb[0].mxu1 }
 0x195   :  { %v1452_v19 = vpop.f32.mrb[1].mxu1 }
 0x196   :  { %v1453_v20 = vadd.f32 %v1452_v19, %v1451_v18  ;;  %v1454_v21 = vpop.f32.mrb[2].mxu1 }
 0x197   :  { %v1455_v22 = vpop.f32.mrb[3].mxu1 }
 0x198   :  { %v1456_v23 = vadd.f32 %v1455_v22, %v1454_v21 }
 0x1aa   :  { %v1457_v24 = vpop.f32.mrb[4].mxu1 }
 0x1ab   :  { %v1458_v25 = vpop.f32.mrb[5].mxu1 }
 0x1ac   :  { %v1459_v26 = vadd.f32 %v1458_v25, %v1457_v24  ;;  %v1460_v27 = vpop.f32.mrb[6].mxu1 }
 0x1ad   :  { %v1461_v28 = vpop.f32.mrb[7].mxu1 }
 0x1ae   :  { %v1462_v29 = vadd.f32 %v1461_v28, %v1460_v27 }
 0x1b4   :  { %v1479_v30 = vpop.f32.mrb[8].mxu1 }
 0x1b5   :  { %v1480_v31 = vpop.f32.mrb[9].mxu1 }
 0x1b6   :  { %v1481_v32 = vadd.f32 %v1480_v31, %v1479_v30  ;;  %v1482_v33 = vpop.f32.mrb[10].mxu1 }
 0x1b7   :  { %v1483_v34 = vpop.f32.mrb[11].mxu1 }
 0x1b8   :  { %v686_v36 = vadd.f32 %v1481_v32, %v1453_v20  ;;  %v1484_v37 = vadd.f32 %v1483_v34, %v1482_v33 }
 0x1ba   :  { %v689_v39 = vadd.f32 %v1484_v37, %v1456_v23 }
 0x1bb   :  { %v1545_v40 = vpop.f32.mrb[4].mxu0 }
 0x1bc   :  { %v1546_v42 = vpop.f32.mrb[5].mxu0 }
 0x1bd   :  { %v1547_v44 = vadd.f32 %v1546_v42, %v1545_v40  ;;  %v1548_v46 = vpop.f32.mrb[6].mxu0 }
 0x1be   :  { %v1549_v47 = vpop.f32.mrb[7].mxu0 }
 0x1bf   :  { %v1550_v48 = vadd.f32 %v1549_v47, %v1548_v46 }
 0x1c2   :  { %v1485_v50 = vpop.f32.mrb[12].mxu1 }
 0x1c3   :  { %v1486_v51 = vpop.f32.mrb[13].mxu1  ;;  %v1551_v38 = vpop.f32.mrb[8].mxu0 }
 0x1c4   :  { %v1487_v52 = vadd.f32 %v1486_v51, %v1485_v50  ;;  %v1488_v53 = vpop.f32.mrb[14].mxu1  ;;  %v1552_v54 = vpop.f32.mrb[9].mxu0 }
 0x1c5   :  { %v1553_v55 = vadd.f32 %v1552_v54, %v1551_v38  ;;  %v1489_v43 = vpop.f32.mrb[15].mxu1  ;;  %v1554_v57 = vpop.f32.mrb[10].mxu0 }
 0x1c6   :  { %v694_v58 = vadd.f32 %v1487_v52, %v1459_v26  ;;  %v1490_v49 = vadd.f32 %v1489_v43, %v1488_v53  ;;  %v1555_v59 = vpop.f32.mrb[11].mxu0 }
 0x1c7   :  { %v1556_v60 = vadd.f32 %v1555_v59, %v1554_v57 }
 0x1c8   :  { %v697_v61 = vadd.f32 %v1490_v49, %v1462_v29 }
 0x1d4   :  { %v1517_v41 = vpop.f32.mrb[16].mxu1 }
 0x1d5   :  { %v1518_v62 = vpop.f32.mrb[17].mxu1 }
 0x1d6   :  { %v1519_v63 = vadd.f32 %v1518_v62, %v1517_v41  ;;  %v1520_v0 = vpop.f32.mrb[18].mxu1 }
 0x1d7   :  { %v1521_v1 = vpop.f32.mrb[19].mxu1 }
 0x1d8   :  { %v1686_v2 = vadd.f32 %v1519_v63, %v686_v36  ;;  %v1522_v56 = vadd.f32 %v1521_v1, %v1520_v0 }
 0x1da   :  { %v1692_v3 = vadd.f32 %v1522_v56, %v689_v39  ;;  %v1687_v4 = vadd.f32 %v1686_v2, %v1547_v44 }
 0x1db   :  { %v1622_v5 = vpop.f32.mrb[0].mxu0 }
 0x1dc   :  { %v1523_v6 = vpop.f32.mrb[20].mxu1  ;;  %v1121_v7 = vpop.f32.mrb[1].mxu0  ;;  %v1693_v8 = vadd.f32 %v1692_v3, %v1550_v48 }
 0x1dd   :  { %v1524_v9 = vpop.f32.mrb[21].mxu1  ;;  %v1688_v10 = vadd.f32 %v1687_v4, %v1121_v7  ;;  %v1623_v12 = vpop.f32.mrb[2].mxu0 }
 0x1de   :  { %v1525_v13 = vadd.f32 %v1524_v9, %v1523_v6  ;;  %v1526_v14 = vpop.f32.mrb[22].mxu1  ;;  %v1124_v15 = vpop.f32.mrb[3].mxu0 }
 0x1df   :  { %v1527_v17 = vpop.f32.mrb[23].mxu1  ;;  %v1694_v18 = vadd.f32 %v1693_v8, %v1124_v15  ;;  %v1143_v20 = vadd.f32 %v1688_v10, %v1433_v11 }
 0x1e0   :  { %v1683_v19 = vadd.f32 %v1525_v13, %v694_v58  ;;  %v1528_v35 = vadd.f32 %v1527_v17, %v1526_v14 }
 0x1e1   :  { %v1144_v21 = vadd.f32 %v1694_v18, %v1433_v11  ;;  %v1147_v26 = vmax.f32 %v1143_v20, 0.0 }
 0x1e2   :  { %v1684_v22 = vadd.f32 %v1683_v19, %v1553_v55  ;;  %v1689_v23 = vadd.f32 %v1528_v35, %v697_v61  ;;  %v1434_v55 = vld [vmem:[%s2165_s5] ss:$0 sm:$0xff] }
 0x1e3   :  { %v1148_v24 = vmax.f32 %v1144_v21, 0.0 }
 0x1e4   :  { %v1685_v25 = vadd.f32 %v1684_v22, %v1622_v5  ;;  %v1690_v27 = vadd.f32 %v1689_v23, %v1556_v60 }
 0x1e5   :  { %v1161_v28 = vsel %vm1155_vm5, %v1148_v24, 0.0 }
 0x1e6   :  { %v1691_v29 = vadd.f32 %v1690_v27, %v1623_v12  ;;  %v1164_v30 = vmax.f32 %v1147_v26, %v1161_v28  ;;  %v1145_v31 = vadd.f32 %v1685_v25, %v1433_v11 }
 0x1e8   :  { %v1146_v32 = vadd.f32 %v1691_v29, %v1433_v11  ;;  %v1165_v33 = vrot.slane %v1164_v30, 4  ;;  %v1149_v37 = vmax.f32 %v1145_v31, 0.0 }
 0x1ea   :  { %v1150_v34 = vmax.f32 %v1146_v32, 0.0  ;;  %v1166_v36 = vmax.f32 %v1164_v30, %v1165_v33 }
 0x1ec   :  { %v1163_v39 = vsel %vm1155_vm5, %v1150_v34, 0.0  ;;  %v1167_v40 = vrot.slane %v1166_v36, 2 }
 0x1ed   :  { %v1171_v42 = vmax.f32 %v1149_v37, %v1163_v39 }
 0x1ee   :  { %v1168_v46 = vmax.f32 %v1166_v36, %v1167_v40 }
 0x1ef   :  { %v1172_v44 = vrot.slane %v1171_v42, 4 }
 0x1f0   :  { %v1169_v50 = vrot.slane %v1168_v46, 1 }
 0x1f1   :  { %v1173_v47 = vmax.f32 %v1171_v42, %v1172_v44 }
 0x1f2   :  { %v1170_v52 = vmax.f32 %v1168_v46, %v1169_v50 }
 0x1f3   :  { %v1174_v48 = vrot.slane %v1173_v47, 2 }
 0x1f5   :  { %v1175_v51 = vmax.f32 %v1173_v47, %v1174_v48 }
 0x1f7   :  { %v1176_v38 = vrot.slane %v1175_v51, 1 }
 0x1f9   :  { %v1177_v53 = vmax.f32 %v1175_v51, %v1176_v38 }
 0x1fb   :  { %v1204_v54 = vsel %vm1203_vm8, %v1177_v53, %v1170_v52 }
 0x1fc   :  { %1657 = vmatmul.mubr.f32.vlgmr.msra.gmra.mrb[24].mxu1 %v1204_v54 }
 0x2cf   :  { %v1272_v43 = vpop.f32.mrb[24].mxu1 }
 0x2d0   :  { %v1273_v57 = vadd.f32 %v1434_v55, %v1272_v43  ;;  %v1658_v58 = vpop.f32.mrb[25].mxu1 }
 0x2d2   :  { %1276 = vst [vmem:[#allocation8] sm:$0x3] %v1273_v57 }
 0x2d3   :  { %1887 = shalt.err (!%p1884_p0)
}
 0x2d4   :  { %s1888_s25 = scalar_lea.hbm %s2166_s6, 32 }
 0x2d5   :  { %p1889_p1 = scmp.ne.s32.totalorder %s2166_s6, %s1888_s25  ;;  %p1892_p2 = scmp.lt.u32.totalorder %s1888_s25, %s2166_s6 }
 0x2d7   :  { %p1894_p3 = pnand %p1892_p2, %p1889_p1 }
 0x2d9   :  { %1897 = shalt.err (!%p1894_p3)
}
 0x2da   :  { %1286 = dma.vmem_to_hbm [thread:$0]  %s1284_s2, 32, %s2166_s6, [#allocation4]  }
 0x2db   :  { %1902 = dma.done.wait [#allocation4], 32  }
 0x2dc   :  { %1903 = vsyncadd [#allocation4], 4294967264 }
 0x2dd   :  { %1290 = vsyncpa [#allocation3], 1 }
 0x2de   :  { %1291 = vsyncpa [#allocation6], 1 }
 0x2df   :  { %1292 = vsyncpa [#allocation4], 1 }

</bundles_post_ra>
